<compile_context>
chip_gen: v7x
topology: tpu7x:2x2x1
jax: 0.10.0
libtpu: 0.0.40
codegen_flags: <defaults>
</compile_context>

<pallas_src>
import math

import jax
import jax.numpy as jnp
from jax.experimental import pallas as pl
from jax.experimental.pallas import tpu as pltpu

# Module hyper-parameters (UnsharpMask defaults)
C = 4            # channels
K = 11           # gaussian kernel size
PAD = 5          # conv padding ("same" output)
SIGMA = 1.0      # UnsharpMask passes sigma=1.0 to GaussianBlur
AMOUNT = 1.0
THRESHOLD = 0    # default -> the torch.where branch is not taken
LEAKY_SLOPE = 0.01   # ABN default activation: leaky_relu(0.01)
EPS = 1e-5           # ABN/BatchNorm eps


def gaussian_taps_1d(kernel_size: int, sigma: float) -> jnp.ndarray:
    """Normalized 1D taps; outer(gn, gn) equals the normalized 2D filter."""
    coords = jnp.arange(kernel_size, dtype=jnp.float32)
    mean = (kernel_size - 1) / 2.0
    var = sigma ** 2
    g = jnp.exp(-((coords - mean) ** 2) / (2.0 * var))
    return g / jnp.sum(g)


def gaussian_weights_2d(kernel_size: int, sigma: float) -> jnp.ndarray:
    """Same math as GaussianBlur.calculate_weights (used only by the reference)."""
    coords = jnp.arange(kernel_size, dtype=jnp.float32)
    mean = (kernel_size - 1) / 2.0
    var = sigma ** 2
    g1 = jnp.exp(-((coords - mean) ** 2) / (2.0 * var))
    g2 = (1.0 / (2.0 * math.pi * var)) * jnp.outer(g1, g1)
    return g2 / jnp.sum(g2)


def banded_toeplitz(g: jnp.ndarray, n: int) -> jnp.ndarray:
    """T[i, r] = g[r - i + PAD] for |r - i| <= PAD else 0 (zero-padded 'same' conv)."""
    i = jnp.arange(n)[:, None]
    r = jnp.arange(n)[None, :]
    d = r - i + PAD
    valid = (d >= 0) & (d < K)
    return jnp.where(valid, g[jnp.clip(d, 0, K - 1)], 0.0).astype(jnp.float32)


def usm_kernel(x_ref, scale_ref, shift_ref, th_ref, twb_ref, o_ref):
    # x_ref:     (H, L) with L = N*C*W   (lane-dense layout, H-major over planes)
    # scale/shift: (1, L) folded eval-mode batch-norm affine, per lane
    # th_ref:    (H, H)  vertical banded Toeplitz (blur along H)
    # twb_ref:   (L, L)  block-diagonal horizontal Toeplitz (blur along W per plane)
    x = x_ref[...].astype(jnp.float32)

    # ABN: batch-norm (eval-mode stats folded into scale/shift) + leaky_relu(0.01)
    y = x * scale_ref[...] + shift_ref[...]
    y = jnp.where(y >= 0, y, LEAKY_SLOPE * y)

    # Separable 11x11 Gaussian blur as two MXU matmuls; the zero "same" padding is
    # encoded in the band structure of the Toeplitz operators.
    blur_v = jnp.dot(th_ref[...], y,
                     preferred_element_type=jnp.float32,
                     precision=jax.lax.Precision.HIGHEST)
    blurred = jnp.dot(blur_v, twb_ref[...],
                      preferred_element_type=jnp.float32,
                      precision=jax.lax.Precision.HIGHEST)

    # sharpened = res * (amount + 1) - blurred * amount   (threshold == 0 branch)
    o_ref[...] = (y * (AMOUNT + 1.0) - blurred * AMOUNT).astype(o_ref.dtype)


def unsharp_mask(x, gamma, beta, running_mean, running_var, sigma=SIGMA):
    N, Ch, H, W = x.shape
    L = N * Ch * W

    # Fold batch-norm into per-channel scale/shift.
    # TODO(synk): ABN in training mode uses per-batch statistics; eval-mode running
    # statistics are used here (deterministic forward semantics).
    scale = (gamma / jnp.sqrt(running_var + EPS)).astype(jnp.float32)
    shift = (beta - running_mean * scale).astype(jnp.float32)

    # Lane-dense layout plumbing: (N, C, H, W) -> (H, N*C*W).
    x2 = jnp.transpose(x, (2, 0, 1, 3)).reshape(H, L)
    scale_row = jnp.broadcast_to(scale[None, :, None], (N, Ch, W)).reshape(1, L)
    shift_row = jnp.broadcast_to(shift[None, :, None], (N, Ch, W)).reshape(1, L)

    # Separable Gaussian: blurred = T_H @ y @ T_W^T.
    gn = gaussian_taps_1d(K, sigma)
    t_h = banded_toeplitz(gn, H)                       # (H, H)
    t_w_t = banded_toeplitz(gn, W).T                   # (W, W) (symmetric for a Gaussian)
    # Block-diagonal horizontal operator so each (n, c) plane only mixes its own W
    # columns inside the fused lane axis.
    # TODO(synk): for large N*C*W, tile the horizontal pass per plane instead of
    # materializing the (L, L) block-diagonal operator.
    t_w_blk = jnp.kron(jnp.eye(N * Ch, dtype=jnp.float32), t_w_t)   # (L, L)

    out2 = pl.pallas_call(
        usm_kernel,
        out_shape=jax.ShapeDtypeStruct((H, L), x.dtype),
        in_specs=[
            pl.BlockSpec(memory_space=pltpu.MemorySpace.VMEM),   # x2       (H, L)
            pl.BlockSpec(memory_space=pltpu.MemorySpace.VMEM),   # scale    (1, L)
            pl.BlockSpec(memory_space=pltpu.MemorySpace.VMEM),   # shift    (1, L)
            pl.BlockSpec(memory_space=pltpu.MemorySpace.VMEM),   # T_H      (H, H)
            pl.BlockSpec(memory_space=pltpu.MemorySpace.VMEM),   # T_W blk  (L, L)
        ],
        out_specs=pl.BlockSpec(memory_space=pltpu.MemorySpace.VMEM),
    )(x2, scale_row, shift_row, t_h, t_w_blk)

    return jnp.transpose(out2.reshape(H, N, Ch, W), (1, 2, 0, 3))


def reference(x, gamma, beta, running_mean, running_var, w2d):
    """Pure-JAX reference mirroring the PyTorch forward (full 2D depthwise conv)."""
    scale = gamma / jnp.sqrt(running_var + EPS)
    shift = beta - running_mean * scale
    y = x * scale[None, :, None, None] + shift[None, :, None, None]
    y = jnp.where(y >= 0, y, LEAKY_SLOPE * y)
    w = jnp.broadcast_to(w2d[None, None], (x.shape[1], 1, K, K))
    blurred = jax.lax.conv_general_dilated(
        y, w, window_strides=(1, 1), padding=[(PAD, PAD), (PAD, PAD)],
        dimension_numbers=("NCHW", "OIHW", "NCHW"),
        feature_group_count=x.shape[1])
    return y * (AMOUNT + 1.0) - blurred * AMOUNT


if __name__ == "__main__":
    key = jax.random.PRNGKey(0)
    kx, kg, kb, km, kv = jax.random.split(key, 5)

    N, H, W = 2, 16, 16
    x = jax.random.normal(kx, (N, C, H, W), dtype=jnp.float32)

    # Deterministic synthetic ABN parameters (not a checkpoint).
    gamma = 1.0 + 0.1 * jax.random.normal(kg, (C,), dtype=jnp.float32)
    beta = 0.1 * jax.random.normal(kb, (C,), dtype=jnp.float32)
    running_mean = 0.1 * jax.random.normal(km, (C,), dtype=jnp.float32)
    running_var = 1.0 + 0.1 * jax.random.uniform(kv, (C,), dtype=jnp.float32)

    out = unsharp_mask(x, gamma, beta, running_mean, running_var)
    out = jax.block_until_ready(out)

    w2d = gaussian_weights_2d(K, SIGMA)
    ref = reference(x, gamma, beta, running_mean, running_var, w2d)
    assert out.shape == (N, C, H, W)
    assert jnp.allclose(out, ref, atol=1e-4, rtol=1e-4), "mismatch vs reference"

    print("KERNEL_OK")
</pallas_src>

<mosaic_0001>
module attributes {stable_mosaic.version = 11 : i64} {
  func.func @usm_kernel(%arg0: memref<16x128xf32, #tpu.memory_space<vmem>>, %arg1: memref<1x128xf32, #tpu.memory_space<vmem>>, %arg2: memref<1x128xf32, #tpu.memory_space<vmem>>, %arg3: memref<16x16xf32, #tpu.memory_space<vmem>>, %arg4: memref<128x128xf32, #tpu.memory_space<vmem>>, %arg5: memref<16x128xf32, #tpu.memory_space<vmem>>) attributes {dimension_semantics = [], scalar_prefetch = 0 : i64, scratch_operands = 0 : i64, tpu.core_type = #tpu.core_type<tc>} {
    %c0 = arith.constant 0 : index
    %c0_0 = arith.constant 0 : index
    %0 = vector.load %arg0[%c0, %c0_0] : memref<16x128xf32, #tpu.memory_space<vmem>>, vector<16x128xf32>
    %c0_1 = arith.constant 0 : index
    %c0_2 = arith.constant 0 : index
    %1 = vector.load %arg1[%c0_1, %c0_2] : memref<1x128xf32, #tpu.memory_space<vmem>>, vector<1x128xf32>
    %2 = vector.broadcast %1 : vector<1x128xf32> to vector<16x128xf32>
    %3 = arith.mulf %0, %2 : vector<16x128xf32>
    %c0_3 = arith.constant 0 : index
    %c0_4 = arith.constant 0 : index
    %4 = vector.load %arg2[%c0_3, %c0_4] : memref<1x128xf32, #tpu.memory_space<vmem>>, vector<1x128xf32>
    %5 = vector.broadcast %4 : vector<1x128xf32> to vector<16x128xf32>
    %6 = arith.addf %3, %5 : vector<16x128xf32>
    %cst = arith.constant 0.000000e+00 : f32
    %7 = vector.broadcast %cst : f32 to vector<16x128xf32>
    %8 = arith.cmpf oge, %6, %7 : vector<16x128xf32>
    %cst_5 = arith.constant 0.00999999977 : f32
    %9 = vector.broadcast %cst_5 : f32 to vector<16x128xf32>
    %10 = arith.mulf %9, %6 : vector<16x128xf32>
    %11 = arith.select %8, %6, %10 : vector<16x128xi1>, vector<16x128xf32>
    %c0_6 = arith.constant 0 : index
    %c0_7 = arith.constant 0 : index
    %12 = vector.load %arg3[%c0_6, %c0_7] : memref<16x16xf32, #tpu.memory_space<vmem>>, vector<16x16xf32>
    %cst_8 = arith.constant dense<0.000000e+00> : vector<16x128xf32>
    %13 = tpu.matmul %12, %11, %cst_8 {dimension_numbers = #tpu.dot_dimension_numbers<[1], [0], [0], [1], [0, 0, 1, 1], [], []>, precision = #tpu.contract_precision<fp32>} : vector<16x16xf32>, vector<16x128xf32>, vector<16x128xf32> -> vector<16x128xf32>
    %c0_9 = arith.constant 0 : index
    %c0_10 = arith.constant 0 : index
    %14 = vector.load %arg4[%c0_9, %c0_10] : memref<128x128xf32, #tpu.memory_space<vmem>>, vector<128x128xf32>
    %cst_11 = arith.constant dense<0.000000e+00> : vector<16x128xf32>
    %15 = tpu.matmul %13, %14, %cst_11 {dimension_numbers = #tpu.dot_dimension_numbers<[1], [0], [0], [1], [0, 0, 1, 1], [], []>, precision = #tpu.contract_precision<fp32>} : vector<16x128xf32>, vector<128x128xf32>, vector<16x128xf32> -> vector<16x128xf32>
    %cst_12 = arith.constant 2.000000e+00 : f32
    %16 = vector.broadcast %cst_12 : f32 to vector<16x128xf32>
    %17 = arith.mulf %11, %16 : vector<16x128xf32>
    %cst_13 = arith.constant 1.000000e+00 : f32
    %18 = vector.broadcast %cst_13 : f32 to vector<16x128xf32>
    %19 = arith.mulf %15, %18 : vector<16x128xf32>
    %20 = arith.subf %17, %19 : vector<16x128xf32>
    %c0_14 = arith.constant 0 : index
    %c0_15 = arith.constant 0 : index
    %21 = vector.load %arg5[%c0_14, %c0_15] : memref<16x128xf32, #tpu.memory_space<vmem>>, vector<16x128xf32>
    tpu.vector_store %arg5[%c0_14, %c0_15], %20 {strides = array<i32>} : memref<16x128xf32, #tpu.memory_space<vmem>>, vector<16x128xf32>,
    return
  }
}

</mosaic_0001>

<bundles_post_ra>
// kernel: tpu_custom_call.1
= control target key start
LH: loop header
LB: loop body
LE: loop exit
PB: predicated region body
PF: predicated region fallthrough
CT: control target
= control target key end

     0   :  { %10 = vsyncpa [#allocation3], 0  ;;  %s2443_s0 = inlined_call_operand.hbm [shape: f32[16,128], index: 0, kind: input, shape index: {}]   ;;  %s2444_s1 = inlined_call_operand.vmem [shape: f32[1,128], index: 1, kind: input, shape index: {}]   ;;  %s2445_s2 = inlined_call_operand.vmem [shape: f32[1,128], index: 2, kind: input, shape index: {}]   ;;  %s2446_s3 = inlined_call_operand.hbm [shape: f32[16,16], index: 3, kind: input, shape index: {}]   ;;  %s2447_s4 = inlined_call_operand.hbm [shape: f32[128,128], index: 4, kind: input, shape index: {}]   ;;  %s2448_s5 = inlined_call_operand.hbm [shape: f32[16,128], index: 5, kind: output, shape index: {}]  }
   0x1   :  { %11 = vsyncpa [#allocation6], 0 }
   0x2   :  { %12 = vsyncpa [#allocation4], 0  ;;  %s2045_s18 = smov [#allocation5]   ;;  %s2046_s20 = smov [#allocation2]  }
   0x3   :  { %s34_s19 = sshll.u32 %s2045_s18, 4  ;;  %s18_s21 = sshll.u32 %s2046_s20, 4  ;;  %s35_s19 = int_to_ptr.vmem [resolvable:$true] %s34_s19  ;;  %s2081_s21 = int_to_ptr.vmem [resolvable:$true] %s18_s21 }
   0x4   :  { %s1951_s24 = scalar_lea.hbm %s2446_s3, 256 }
   0x5   :  { %p1952_p0 = scmp.ne.s32.totalorder %s2446_s3, %s1951_s24  ;;  %p1955_p1 = scmp.lt.u32.totalorder %s1951_s24, %s2446_s3 }
   0x7   :  { %p1957_p2 = pnand %p1955_p1, %p1952_p0 }
   0x9   :  { %1960 = shalt.err (!%p1957_p2)
}
   0xa   :  { %s1961_s29 = scalar_lea.vmem %s35_s19, 256  ;;  %p1966_p4 = scmp.lt.s32.totalorder %s35_s19, %s35_s19 }
   0xb   :  { %p1962_p3 = scmp.ne.s32.totalorder %s35_s19, %s1961_s29  ;;  %p1967_p5 = scmp.lt.s32.totalorder %s1961_s29, %s1961_s29 }
   0xd   :  { %p1968_p6 = por %p1967_p5, %p1966_p4 }
   0xf   :  { %p1969_p7 = pnand %p1968_p6, %p1962_p3 }
  0x11   :  { %1972 = shalt.err (!%p1969_p7)
}
  0x12   :  { %s2047_s30 = smov 128   ;;  %s2048_s6 = smov 8  }
  0x13   :  { %40 = dma.hbm_to_vmem [thread:$0]  %s2446_s3, 256, %s35_s19, [#allocation6], %s2047_s30, %s2047_s30, %s2048_s6  }
  0x14   :  { %s1973_s11 = scalar_lea.hbm %s2443_s0, 256 }
  0x15   :  { %p1974_p8 = scmp.ne.s32.totalorder %s2443_s0, %s1973_s11  ;;  %p1977_p9 = scmp.lt.u32.totalorder %s1973_s11, %s2443_s0 }
  0x17   :  { %p1979_p10 = pnand %p1977_p9, %p1974_p8 }
  0x19   :  { %1982 = shalt.err (!%p1979_p10)
}
  0x1a   :  { %s1983_s16 = scalar_lea.vmem %s2081_s21, 256  ;;  %p1988_p12 = scmp.lt.s32.totalorder %s2081_s21, %s2081_s21 }
  0x1b   :  { %p1984_p11 = scmp.ne.s32.totalorder %s2081_s21, %s1983_s16  ;;  %p1989_p13 = scmp.lt.s32.totalorder %s1983_s16, %s1983_s16 }
  0x1d   :  { %p1990_p0 = por %p1989_p13, %p1988_p12 }
  0x1f   :  { %p1991_p1 = pnand %p1990_p0, %p1984_p11 }
  0x21   :  { %1994 = shalt.err (!%p1991_p1)
}
  0x22   :  { %24 = dma.hbm_to_vmem [thread:$0]  %s2443_s0, 256, %s2081_s21, [#allocation3], %s2047_s30, %s2047_s30, %s2048_s6  }
  0x23   :  { %s2049_s18 = smov [#allocation7]   ;;  %s1995_s23 = scalar_lea.hbm %s2447_s4, 2048 }
  0x24   :  { %s46_s19 = sshll.u32 %s2049_s18, 4  ;;  %p1996_p2 = scmp.ne.s32.totalorder %s2447_s4, %s1995_s23  ;;  %s47_s19 = int_to_ptr.vmem [resolvable:$true] %s46_s19 }
  0x25   :  { %p1999_p3 = scmp.lt.u32.totalorder %s1995_s23, %s2447_s4 }
  0x27   :  { %p2001_p4 = pnand %p1999_p3, %p1996_p2 }
  0x29   :  { %2004 = shalt.err (!%p2001_p4)
}
  0x2a   :  { %s2005_s28 = scalar_lea.vmem %s47_s19, 2048  ;;  %p2010_p6 = scmp.lt.s32.totalorder %s47_s19, %s47_s19 }
  0x2b   :  { %p2006_p5 = scmp.ne.s32.totalorder %s47_s19, %s2005_s28  ;;  %p2011_p7 = scmp.lt.s32.totalorder %s2005_s28, %s2005_s28 }
  0x2d   :  { %p2012_p8 = por %p2011_p7, %p2010_p6 }
  0x2f   :  { %p2013_p9 = pnand %p2012_p8, %p2006_p5 }
  0x31   :  { %2016 = shalt.err (!%p2013_p9)
}
  0x32   :  { %52 = dma.hbm_to_vmem [thread:$0]  %s2447_s4, 2048, %s47_s19, [#allocation6], %s2047_s30, %s2047_s30, %s2048_s6  }
  0x33   :  { %2039 = dma.done.wait [#allocation3], 256  }
  0x34   :  { %2040 = vsyncadd [#allocation3], 4294967040 }
  0x35   :  { %2041 = dma.done.wait [#allocation6], 2304  }
  0x36   :  { %2042 = vsyncadd [#allocation6], 4294964992  ;;  %vm90_vm0 = vcmask 130048   ;;  %v62_v0 = vld [vmem:[#allocation2] sm:$0xff]  ;;  %v63_v1 = vld [vmem:[#allocation2 + $0x8] sm:$0xff] }
  0x37   :  { %v1323_v2 = vld [vmem:[%s2444_s1] ss:$0 sm:$0xff]  ;;  %v88_v6 = vld [vmem:[#allocation5] sm:$0xff]  ;;  %v89_v7 = vld [vmem:[#allocation5 + $0x8] sm:$0xff]  ;;  %s2050_s1 = smov [#allocation8]  }
  0x38   :  { %v71_v3 = vmul.f32 %v1323_v2, %v62_v0  ;;  %v72_v4 = vmul.f32 %v1323_v2, %v63_v1  ;;  %v1324_v5 = vld [vmem:[%s2445_s2] ss:$0 sm:$0xff]  ;;  %v92_v8 = vsel %vm90_vm0, %v88_v6, 0  ;;  %v95_v9 = vsel %vm90_vm0, %v89_v7, 0  ;;  %v2156_v38 = vld [vmem:[#allocation7 + $0x8] sm:$0xff]  ;;  %v2167_v45 = vld [vmem:[#allocation7 + $0x10] sm:$0xff] }
  0x39   :  { %v164_v12 = vand.u32 4294901760, %v92_v8  ;;  %v2139_v13 = vand.u32 4294901760, %v95_v9  ;;  %v2154_v37 = vld [vmem:[#allocation7] sm:$0xff]  ;;  %v619_v43 = vand.u32 4294901760, %v2156_v38  ;;  %v2169_v46 = vld [vmem:[#allocation7 + $0x18] sm:$0xff]  ;;  %v622_v47 = vand.u32 4294901760, %v2167_v45 }
  0x3a   :  { %v80_v10 = vadd.f32 %v1324_v5, %v71_v3  ;;  %v81_v11 = vadd.f32 %v1324_v5, %v72_v4  ;;  %v616_v42 = vand.u32 4294901760, %v2154_v37  ;;  %v625_v48 = vand.u32 4294901760, %v2169_v46  ;;  %v2176_v49 = vld [vmem:[#allocation7 + $0x20] sm:$0xff]  ;;  %v2178_v50 = vld [vmem:[#allocation7 + $0x28] sm:$0xff]  ;;  %v2189_v54 = vld [vmem:[#allocation7 + $0x30] sm:$0xff]  ;;  %s1310_s2 = sshll.u32 %s2050_s1, 4  ;;  %s1311_s2 = int_to_ptr.vmem [resolvable:$true] %s1310_s2 }
  0x3b   :  { %v165_v16 = vsub.f32 %v92_v8, %v164_v12  ;;  %v2142_v17 = vsub.f32 %v95_v9, %v2139_v13  ;;  %v628_v52 = vand.u32 4294901760, %v2176_v49  ;;  %v631_v53 = vand.u32 4294901760, %v2178_v50  ;;  %v2191_v55 = vld [vmem:[#allocation7 + $0x38] sm:$0xff]  ;;  %v2206_v59 = vld [vmem:[#allocation7 + $0x40] sm:$0xff]  ;;  %v2208_v60 = vld [vmem:[#allocation7 + $0x48] sm:$0xff]  ;;  %s2017_s4 = scalar_lea.vmem %s1311_s2, 256  ;;  %p2022_p11 = scmp.lt.s32.totalorder %s1311_s2, %s1311_s2 }
  0x3c   :  { %vm82_vm1 = vcmp.ge.f32.partialorder %v80_v10, 0.0  ;;  %vm83_vm2 = vcmp.ge.f32.partialorder %v81_v11, 0.0  ;;  %v84_v14 = vmul.f32 0.01, %v80_v10  ;;  %v85_v15 = vmul.f32 0.01, %v81_v11  ;;  %p2018_p10 = scmp.ne.s32.totalorder %s1311_s2, %s2017_s4  ;;  %p2023_p12 = scmp.lt.s32.totalorder %s2017_s4, %s2017_s4 }
  0x3d   :  { %v166_v22 = vand.u32 4294901760, %v165_v16  ;;  %v176_v23 = vand.u32 4294901760, %v2142_v17  ;;  %v2164_v44 = vpack.c.bf16 %v619_v43, %v616_v42  ;;  %v2184_v51 = vpack.c.bf16 %v625_v48, %v622_v47  ;;  %v2222_v0 = vld [vmem:[#allocation7 + $0x50] sm:$0xff]  ;;  %v2224_v1 = vld [vmem:[#allocation7 + $0x58] sm:$0xff]  ;;  %v611_v6 = vld [vmem:[#allocation7 + $0x60] sm:$0xff] }
  0x3e   :  { %v2144_v18 = vsel %vm82_vm1, %v80_v10, %v84_v14  ;;  %v2146_v19 = vsel %vm83_vm2, %v81_v11, %v85_v15  ;;  %v2202_v56 = vpack.c.bf16 %v631_v53, %v628_v52  ;;  %v634_v57 = vand.u32 4294901760, %v2189_v54  ;;  %v612_v7 = vld [vmem:[#allocation7 + $0x68] sm:$0xff]  ;;  %v613_v11 = vld [vmem:[#allocation7 + $0x70] sm:$0xff]  ;;  %p2024_p13 = por %p2023_p12, %p2022_p11 }
  0x3f   :  { %v98_v20 = vand.u32 4294901760, %v2144_v18  ;;  %v101_v21 = vand.u32 4294901760, %v2146_v19  ;;  %v167_v25 = vsub.f32 %v165_v16, %v166_v22  ;;  %1482 = vmatprep.mubr.f32.mxu0 %v166_v22  ;;  %v177_v26 = vsub.f32 %v2142_v17, %v176_v23 }
  0x40   :  { %v637_v58 = vand.u32 4294901760, %v2191_v55  ;;  %v640_v62 = vand.u32 4294901760, %v2206_v59  ;;  %v643_v63 = vand.u32 4294901760, %v2208_v60  ;;  %v646_v3 = vand.u32 4294901760, %v2222_v0  ;;  %p2025_p0 = pnand %p2024_p13, %p2018_p10 }
  0x41   :  { %v1709_v24 = vpack.c.bf16 %v101_v21, %v98_v20  ;;  %v186_v27 = vsub.f32 %v2144_v18, %v98_v20  ;;  %v193_v28 = vsub.f32 %v2146_v19, %v101_v21  ;;  %v168_v29 = vand.u32 4294901760, %v167_v25 }
  0x42   :  { %v178_v30 = vand.u32 4294901760, %v177_v26  ;;  %v2218_v61 = vpack.c.bf16 %v637_v58, %v634_v57  ;;  %v2234_v2 = vpack.c.bf16 %v643_v63, %v640_v62  ;;  %v649_v4 = vand.u32 4294901760, %v2224_v1 }
  0x43   :  { %1710 = vmatprep.subr.bf16.mxu1 %v1709_v24  ;;  %1722 = vmatprep.subr.bf16.mxu0 %v1709_v24  ;;  %v187_v31 = vand.u32 4294901760, %v186_v27  ;;  %v194_v32 = vand.u32 4294901760, %v193_v28  ;;  %v1717_v41 = vpack.c.bf16 %v193_v28, %v186_v27  ;;  %v652_v8 = vand.u32 4294901760, %v611_v6 }
  0x44   :  { %1712 = vmatpush3.bf16.msra.mxu1 %v1709_v24  ;;  %1724 = vmatpush3.bf16.msra.mxu0 %v1709_v24  ;;  %v2246_v5 = vpack.c.bf16 %v649_v4, %v646_v3  ;;  %v655_v9 = vand.u32 4294901760, %v612_v7 }
  0x45   :  { %1461 = vmatprep.mubr.f32.mxu1 %v168_v29  ;;  %v188_v33 = vsub.f32 %v186_v27, %v187_v31  ;;  %v195_v34 = vsub.f32 %v193_v28, %v194_v32  ;;  %v1725_v35 = vpack.c.bf16 %v194_v32, %v187_v31  ;;  %v802_v28 = vsub.f32 %v611_v6, %v652_v8 }
  0x46   :  { %v2254_v10 = vpack.c.bf16 %v655_v9, %v652_v8  ;;  %v809_v29 = vsub.f32 %v612_v7, %v655_v9 }
  0x47   :  { %1462 = vmatmul.mubr.f32.vlgmr.msra.gmra.mrb[0].mxu1 %v178_v30  ;;  %1483 = vmatmul.mubr.f32.vlgmr.msra.gmra.mrb[0].mxu0 %v176_v23  ;;  %v189_v36 = vand.u32 4294901760, %v188_v33  ;;  %v196_v39 = vand.u32 4294901760, %v195_v34  ;;  %v803_v30 = vand.u32 4294901760, %v802_v28 }
  0x48   :  { %1726 = vmatprep.subr.bf16.mxu0 %v1725_v35  ;;  %1468 = vmatprep.mubr.f32.mxu1 %v164_v12  ;;  %v810_v31 = vand.u32 4294901760, %v809_v29 }
  0x49   :  { %1728 = vmatpush3.bf16.msra.mxu0 %v1725_v35  ;;  %1489 = vmatprep.mubr.f32.mxu0 %v164_v12  ;;  %v1713_v40 = vpack.c.bf16 %v196_v39, %v189_v36  ;;  %v804_v32 = vsub.f32 %v802_v28, %v803_v30 }
  0x4a   :  { %1730 = vmatprep.subr.bf16.mxu0 %v1709_v24  ;;  %v2278_v35 = vpack.c.bf16 %v810_v31, %v803_v30  ;;  %v811_v36 = vsub.f32 %v809_v29, %v810_v31 }
  0x4b   :  { %1714 = vmatprep.subr.bf16.mxu1 %v1713_v40 }
  0x4c   :  { %1716 = vmatpush3.bf16.msra.mxu1 %v1713_v40  ;;  %v812_v40 = vand.u32 4294901760, %v811_v36 }
  0x4d   :  { %1718 = vmatprep.subr.bf16.mxu1 %v1717_v41 }
  0x4f   :  { %1490 = vmatmul.mubr.f32.vlgmr.msra.gmra.mrb[0].mxu0 %v2139_v13  ;;  %1469 = vmatmul.mubr.f32.vlgmr.msra.gmra.mrb[0].mxu1 %v2139_v13 }
  0x50   :  { %1732 = vmatpush3.bf16.msra.mxu0 %v1709_v24  ;;  %1720 = vmatpush3.bf16.msra.mxu1 %v1717_v41 }
  0x51   :  { %1475 = vmatprep.mubr.f32.mxu1 %v165_v16  ;;  %1496 = vmatprep.mubr.f32.mxu0 %v164_v12  ;;  %v614_v12 = vld [vmem:[#allocation7 + $0x78] sm:$0xff]  ;;  %v718_v16 = vsub.f32 %v2154_v37, %v616_v42  ;;  %v805_v37 = vand.u32 4294901760, %v804_v32 }
  0x52   :  { %1830 = vmatprep.subr.bf16.mxu1 %v2164_v44  ;;  %1734 = vmatprep.subr.bf16.mxu0 %v2164_v44  ;;  %v661_v14 = vand.u32 4294901760, %v614_v12 }
  0x53   :  { %v719_v20 = vand.u32 4294901760, %v718_v16 }
  0x54   :  { %v823_v34 = vsub.f32 %v614_v12, %v661_v14 }
  0x55   :  { %v720_v23 = vsub.f32 %v718_v16, %v719_v20 }
  0x56   :  { %v824_v39 = vand.u32 4294901760, %v823_v34 }
  0x57   :  { %1497 = vmatmul.mubr.f32.vlgmr.msra.gmra.mrb[0].mxu0 %v2139_v13  ;;  %1476 = vmatmul.mubr.f32.vlgmr.msra.gmra.mrb[0].mxu1 %v2142_v17  ;;  %v658_v13 = vand.u32 4294901760, %v613_v11  ;;  %v725_v17 = vsub.f32 %v2156_v38, %v619_v43  ;;  %v721_v25 = vand.u32 4294901760, %v720_v23 }
  0x58   :  { %1736 = vmatpush3.bf16.msra.mxu0 %v2164_v44  ;;  %1832 = vmatpush3.bf16.msra.mxu1 %v2164_v44  ;;  %v825_v43 = vsub.f32 %v823_v34, %v824_v39 }
  0x59   :  { %1738 = vmatprep.subr.bf16.mxu0 %v2184_v51  ;;  %1834 = vmatprep.subr.bf16.mxu1 %v2184_v51  ;;  %v2260_v15 = vpack.c.bf16 %v661_v14, %v658_v13  ;;  %v726_v21 = vand.u32 4294901760, %v725_v17  ;;  %v816_v33 = vsub.f32 %v613_v11, %v658_v13  ;;  %v2286_v9 = vpack.c.bf16 %v725_v17, %v718_v16 }
  0x5a   :  { %v826_v7 = vand.u32 4294901760, %v825_v43  ;;  %v2288_v11 = vpack.c.bf16 %v809_v29, %v802_v28  ;;  %v2295_v13 = vsub.f32 %v2167_v45, %v622_v47  ;;  %v2300_v14 = vsub.f32 %v2169_v46, %v625_v48 }
  0x5b   :  { %v2272_v22 = vpack.c.bf16 %v726_v21, %v719_v20  ;;  %v727_v24 = vsub.f32 %v725_v17, %v726_v21  ;;  %v817_v38 = vand.u32 4294901760, %v816_v33  ;;  %v2282_v20 = vpack.c.bf16 %v812_v40, %v805_v37 }
  0x5c   :  { %1740 = vmatpush3.bf16.msra.mxu0 %v2184_v51  ;;  %1836 = vmatpush3.bf16.msra.mxu1 %v2184_v51  ;;  %v2290_v12 = vpack.c.bf16 %v823_v34, %v816_v33  ;;  %v733_v21 = vand.u32 4294901760, %v2295_v13  ;;  %v740_v16 = vand.u32 4294901760, %v2300_v14  ;;  %v2307_v17 = vsub.f32 %v2176_v49, %v628_v52 }
  0x5d   :  { %1742 = vmatprep.subr.bf16.mxu0 %v2202_v56  ;;  %1838 = vmatprep.subr.bf16.mxu1 %v2202_v56  ;;  %v728_v26 = vand.u32 4294901760, %v727_v24  ;;  %v2280_v41 = vpack.c.bf16 %v824_v39, %v817_v38  ;;  %v818_v42 = vsub.f32 %v816_v33, %v817_v38  ;;  %v2312_v45 = vsub.f32 %v2178_v50, %v631_v53 }
  0x5e   :  { %v741_v29 = vsub.f32 %v2300_v14, %v740_v16  ;;  %v747_v30 = vand.u32 4294901760, %v2307_v17  ;;  %v2325_v50 = vsub.f32 %v2189_v54, %v634_v57  ;;  %v2330_v53 = vsub.f32 %v2191_v55, %v637_v58 }
  0x5f   :  { %v2275_v27 = vpack.c.bf16 %v728_v26, %v721_v25  ;;  %v819_v6 = vand.u32 4294901760, %v818_v42  ;;  %v734_v26 = vsub.f32 %v2295_v13, %v733_v21  ;;  %v754_v49 = vand.u32 4294901760, %v2312_v45 }
  0x60   :  { %1744 = vmatpush3.bf16.msra.mxu0 %v2202_v56  ;;  %1840 = vmatpush3.bf16.msra.mxu1 %v2202_v56  ;;  %v742_v36 = vand.u32 4294901760, %v741_v29  ;;  %v748_v37 = vsub.f32 %v2307_v17, %v747_v30  ;;  %v761_v38 = vand.u32 4294901760, %v2325_v50  ;;  %v768_v55 = vand.u32 4294901760, %v2330_v53 }
  0x61   :  { %1746 = vmatprep.subr.bf16.mxu0 %v2218_v61  ;;  %1842 = vmatprep.subr.bf16.mxu1 %v2218_v61  ;;  %v2284_v8 = vpack.c.bf16 %v826_v7, %v819_v6  ;;  %v735_v33 = vand.u32 4294901760, %v734_v26  ;;  %v755_v54 = vsub.f32 %v2312_v45, %v754_v49  ;;  %v2347_v58 = vsub.f32 %v2206_v59, %v640_v62 }
  0x62   :  { %v1865_v40 = vpack.c.bf16 %v740_v16, %v733_v21  ;;  %v2353_v42 = vsub.f32 %v2208_v60, %v643_v63  ;;  %v749_v7 = vand.u32 4294901760, %v748_v37  ;;  %v762_v62 = vsub.f32 %v2325_v50, %v761_v38 }
  0x63   :  { %v1769_v6 = vpack.c.bf16 %v742_v36, %v735_v33  ;;  %v769_v21 = vsub.f32 %v2330_v53, %v768_v55  ;;  %v775_v16 = vand.u32 4294901760, %v2347_v58 }
  0x64   :  { %1748 = vmatpush3.bf16.msra.mxu0 %v2218_v61  ;;  %1844 = vmatpush3.bf16.msra.mxu1 %v2218_v61  ;;  %v782_v63 = vand.u32 4294901760, %v2353_v42 }
  0x65   :  { %1750 = vmatprep.subr.bf16.mxu0 %v2234_v2  ;;  %1846 = vmatprep.subr.bf16.mxu1 %v2234_v2  ;;  %v770_v26 = vand.u32 4294901760, %v769_v21 }
  0x66   :  { %v1877_v29 = vpack.c.bf16 %v782_v63, %v775_v16 }
  0x68   :  { %1752 = vmatpush3.bf16.msra.mxu0 %v2234_v2  ;;  %1848 = vmatpush3.bf16.msra.mxu1 %v2234_v2 }
  0x69   :  { %1754 = vmatprep.subr.bf16.mxu0 %v2246_v5  ;;  %1850 = vmatprep.subr.bf16.mxu1 %v2246_v5 }
  0x6c   :  { %1756 = vmatpush3.bf16.msra.mxu0 %v2246_v5  ;;  %1852 = vmatpush3.bf16.msra.mxu1 %v2246_v5 }
  0x6d   :  { %1854 = vmatprep.subr.bf16.mxu1 %v2254_v10  ;;  %1758 = vmatprep.subr.bf16.mxu0 %v2254_v10 }
  0x70   :  { %1856 = vmatpush3.bf16.msra.mxu1 %v2254_v10  ;;  %1760 = vmatpush3.bf16.msra.mxu0 %v2254_v10 }
  0x71   :  { %1858 = vmatprep.subr.bf16.mxu1 %v2260_v15  ;;  %1762 = vmatprep.subr.bf16.mxu0 %v2260_v15 }
  0x74   :  { %1860 = vmatpush3.bf16.msra.mxu1 %v2260_v15  ;;  %1764 = vmatpush3.bf16.msra.mxu0 %v2260_v15 }
  0x75   :  { %1862 = vmatprep.subr.bf16.mxu1 %v2272_v22  ;;  %1766 = vmatprep.subr.bf16.mxu0 %v2275_v27 }
 0x12a   :  { %v1498_v23 = vpop.f32.mrb[0].mxu0  ;;  %v1477_v47 = vpop.f32.mrb[0].mxu1 }
 0x12b   :  { %v589_v24 = vpop.f32.mrb[1].mxu0  ;;  %v1925_v25 = vadd.f32 %v1498_v23, %v1477_v47  ;;  %v343_v46 = vpop.f32.mrb[1].mxu1  ;;  %v756_v23 = vand.u32 4294901760, %v755_v54  ;;  %v2365_v47 = vsub.f32 %v2222_v0, %v646_v3  ;;  %v776_v0 = vsub.f32 %v2347_v58, %v775_v16 }
 0x12c   :  { %v1926_v48 = vadd.f32 %v589_v24, %v343_v46  ;;  %v1869_v24 = vpack.c.bf16 %v754_v49, %v747_v30  ;;  %v1873_v46 = vpack.c.bf16 %v768_v55, %v761_v38  ;;  %v783_v3 = vsub.f32 %v2353_v42, %v782_v63 }
 0x12d   :  { %v2315_v28 = vand.u32 4294901760, %v1925_v25  ;;  %v777_v30 = vand.u32 4294901760, %v776_v0 }
 0x12e   :  { %v2320_v52 = vand.u32 4294901760, %v1926_v48  ;;  %v784_v49 = vand.u32 4294901760, %v783_v3 }
 0x12f   :  { %v2333_v31 = vsub.f32 %v1925_v25, %v2315_v28  ;;  %v1773_v25 = vpack.c.bf16 %v756_v23, %v749_v7 }
 0x130   :  { %v2336_v32 = vsub.f32 %v1926_v48, %v2320_v52  ;;  %v763_v48 = vand.u32 4294901760, %v762_v62  ;;  %v1781_v36 = vpack.c.bf16 %v784_v49, %v777_v30 }
 0x131   :  { %v708_v34 = vand.u32 4294901760, %v2333_v31 }
 0x132   :  { %v698_v57 = vand.u32 4294901760, %v2336_v32 }
 0x133   :  { %v709_v39 = vsub.f32 %v2333_v31, %v708_v34 }
 0x134   :  { %1636 = vmatprep.mubr.f32.mxu1 %v698_v57  ;;  %v699_v43 = vsub.f32 %v2336_v32, %v698_v57 }
 0x135   :  { %1637 = vmatmul.mubr.f32.vlgmr.msra.gmra.mrb[2].mxu1 %v708_v34  ;;  %v710_v60 = vand.u32 4294901760, %v709_v39 }
 0x136   :  { %1864 = vmatpush3.bf16.msra.mxu1 %v2272_v22  ;;  %1671 = vmatprep.mubr.f32.mxu1 %v2320_v52  ;;  %v700_v59 = vand.u32 4294901760, %v699_v43  ;;  %v2370_v22 = vsub.f32 %v2224_v1, %v649_v4  ;;  %v789_v1 = vand.u32 4294901760, %v2365_v47 }
 0x137   :  { %1866 = vmatprep.subr.bf16.mxu1 %v1865_v40 }
 0x138   :  { %1531 = vmatprep.mubr.f32.mxu0 %v700_v59  ;;  %v796_v4 = vand.u32 4294901760, %v2370_v22  ;;  %v790_v33 = vsub.f32 %v2365_v47, %v789_v1 }
 0x139   :  { %1532 = vmatmul.mubr.f32.vlgmr.msra.gmra.mrb[2].mxu0 %v710_v60 }
 0x13a   :  { %1768 = vmatpush3.bf16.msra.mxu0 %v2275_v27  ;;  %1868 = vmatpush3.bf16.msra.mxu1 %v1865_v40  ;;  %v1777_v27 = vpack.c.bf16 %v770_v26, %v763_v48  ;;  %v797_v34 = vsub.f32 %v2370_v22, %v796_v4  ;;  %v1881_v37 = vpack.c.bf16 %v796_v4, %v789_v1  ;;  %v791_v54 = vand.u32 4294901760, %v790_v33 }
 0x13b   :  { %1566 = vmatprep.mubr.f32.mxu0 %v2320_v52  ;;  %1770 = vmatprep.subr.bf16.mxu0 %v1769_v6 }
 0x13c   :  { %1870 = vmatprep.subr.bf16.mxu1 %v1869_v24  ;;  %v798_v57 = vand.u32 4294901760, %v797_v34 }
 0x13e   :  { %1772 = vmatpush3.bf16.msra.mxu0 %v1769_v6  ;;  %1872 = vmatpush3.bf16.msra.mxu1 %v1869_v24  ;;  %v1785_v38 = vpack.c.bf16 %v798_v57, %v791_v54 }
 0x13f   :  { %1774 = vmatprep.subr.bf16.mxu0 %v1773_v25  ;;  %1874 = vmatprep.subr.bf16.mxu1 %v1873_v46 }
 0x142   :  { %1776 = vmatpush3.bf16.msra.mxu0 %v1773_v25  ;;  %1876 = vmatpush3.bf16.msra.mxu1 %v1873_v46 }
 0x143   :  { %1778 = vmatprep.subr.bf16.mxu0 %v1777_v27  ;;  %1878 = vmatprep.subr.bf16.mxu1 %v1877_v29 }
 0x146   :  { %1780 = vmatpush3.bf16.msra.mxu0 %v1777_v27  ;;  %1880 = vmatpush3.bf16.msra.mxu1 %v1877_v29 }
 0x147   :  { %1782 = vmatprep.subr.bf16.mxu0 %v1781_v36  ;;  %1882 = vmatprep.subr.bf16.mxu1 %v1881_v37 }
 0x14a   :  { %1784 = vmatpush3.bf16.msra.mxu0 %v1781_v36  ;;  %1884 = vmatpush3.bf16.msra.mxu1 %v1881_v37 }
 0x14b   :  { %1786 = vmatprep.subr.bf16.mxu0 %v1785_v38  ;;  %1886 = vmatprep.subr.bf16.mxu1 %v2278_v35 }
 0x14e   :  { %1788 = vmatpush3.bf16.msra.mxu0 %v1785_v38  ;;  %1888 = vmatpush3.bf16.msra.mxu1 %v2278_v35  ;;  %v1801_v35 = vpack.c.bf16 %v2300_v14, %v2295_v13 }
 0x14f   :  { %1790 = vmatprep.subr.bf16.mxu0 %v2282_v20  ;;  %1890 = vmatprep.subr.bf16.mxu1 %v2280_v41 }
 0x152   :  { %1792 = vmatpush3.bf16.msra.mxu0 %v2282_v20  ;;  %1892 = vmatpush3.bf16.msra.mxu1 %v2280_v41  ;;  %v1809_v41 = vpack.c.bf16 %v2330_v53, %v2325_v50  ;;  %v1299_v20 = vmul.f32 2.0, %v2144_v18 }
 0x153   :  { %1794 = vmatprep.subr.bf16.mxu0 %v2284_v8  ;;  %1894 = vmatprep.subr.bf16.mxu1 %v2164_v44 }
 0x155   :  { %1672 = vmatmul.mubr.f32.vlgmr.msra.gmra.mrb[2].mxu1 %v2315_v28 }
 0x156   :  { %1796 = vmatpush3.bf16.msra.mxu0 %v2284_v8  ;;  %1896 = vmatpush3.bf16.msra.mxu1 %v2164_v44  ;;  %v1805_v44 = vpack.c.bf16 %v2312_v45, %v2307_v17 }
 0x157   :  { %1706 = vmatprep.mubr.f32.mxu1 %v2320_v52  ;;  %1798 = vmatprep.subr.bf16.mxu0 %v2286_v9 }
 0x158   :  { %1898 = vmatprep.subr.bf16.mxu1 %v2184_v51 }
 0x159   :  { %1567 = vmatmul.mubr.f32.vlgmr.msra.gmra.mrb[2].mxu0 %v2315_v28 }
 0x15a   :  { %1800 = vmatpush3.bf16.msra.mxu0 %v2286_v9  ;;  %1601 = vmatprep.mubr.f32.mxu0 %v2336_v32 }
 0x15b   :  { %1900 = vmatpush3.bf16.msra.mxu1 %v2184_v51  ;;  %1802 = vmatprep.subr.bf16.mxu0 %v1801_v35  ;;  %v1813_v51 = vpack.c.bf16 %v2353_v42, %v2347_v58 }
 0x15c   :  { %1902 = vmatprep.subr.bf16.mxu1 %v2202_v56 }
 0x15e   :  { %1804 = vmatpush3.bf16.msra.mxu0 %v1801_v35 }
 0x15f   :  { %1904 = vmatpush3.bf16.msra.mxu1 %v2202_v56  ;;  %1806 = vmatprep.subr.bf16.mxu0 %v1805_v44  ;;  %v1817_v56 = vpack.c.bf16 %v2370_v22, %v2365_v47 }
 0x160   :  { %1906 = vmatprep.subr.bf16.mxu1 %v2218_v61 }
 0x162   :  { %1808 = vmatpush3.bf16.msra.mxu0 %v1805_v44 }
 0x163   :  { %1908 = vmatpush3.bf16.msra.mxu1 %v2218_v61  ;;  %1810 = vmatprep.subr.bf16.mxu0 %v1809_v41 }
 0x164   :  { %1910 = vmatprep.subr.bf16.mxu1 %v2234_v2 }
 0x166   :  { %1812 = vmatpush3.bf16.msra.mxu0 %v1809_v41 }
 0x167   :  { %1912 = vmatpush3.bf16.msra.mxu1 %v2234_v2  ;;  %1814 = vmatprep.subr.bf16.mxu0 %v1813_v51 }
 0x168   :  { %1914 = vmatprep.subr.bf16.mxu1 %v2246_v5 }
 0x16a   :  { %1816 = vmatpush3.bf16.msra.mxu0 %v1813_v51 }
 0x16b   :  { %1916 = vmatpush3.bf16.msra.mxu1 %v2246_v5  ;;  %1818 = vmatprep.subr.bf16.mxu0 %v1817_v56  ;;  %v1300_v5 = vmul.f32 2.0, %v2146_v19 }
 0x16c   :  { %1918 = vmatprep.subr.bf16.mxu1 %v2254_v10 }
 0x16e   :  { %1820 = vmatpush3.bf16.msra.mxu0 %v1817_v56 }
 0x16f   :  { %1920 = vmatpush3.bf16.msra.mxu1 %v2254_v10  ;;  %1822 = vmatprep.subr.bf16.mxu0 %v2288_v11 }
 0x170   :  { %1922 = vmatprep.subr.bf16.mxu1 %v2260_v15 }
 0x172   :  { %1824 = vmatpush3.bf16.msra.mxu0 %v2288_v11 }
 0x173   :  { %1924 = vmatpush3.bf16.msra.mxu1 %v2260_v15  ;;  %1826 = vmatprep.subr.bf16.mxu0 %v2290_v12 }
 0x176   :  { %1707 = vmatmul.mubr.f32.vlgmr.msra.gmra.mrb[2].mxu1 %v2315_v28  ;;  %1828 = vmatpush3.bf16.msra.mxu0 %v2290_v12 }
 0x179   :  { %1602 = vmatmul.mubr.f32.vlgmr.msra.gmra.mrb[2].mxu0 %v2333_v31 }
 0x249   :  { %v1708_v61 = vpop.f32.mrb[2].mxu1 }
 0x24a   :  { %v1289_v2 = vpop.f32.mrb[3].mxu1 }
 0x24c   :  { %v1603_v10 = vpop.f32.mrb[2].mxu0 }
 0x24d   :  { %v1927_v8 = vadd.f32 %v1708_v61, %v1603_v10  ;;  %v973_v9 = vpop.f32.mrb[3].mxu0 }
 0x24e   :  { %v1928_v15 = vadd.f32 %v1289_v2, %v973_v9 }
 0x24f   :  { %v1302_v11 = vsub.f32 %v1300_v5, %v1927_v8 }
 0x250   :  { %v1301_v13 = vsub.f32 %v1299_v20, %v1928_v15 }
 0x251   :  { %1304 = vst [vmem:[#allocation8 + $0x8] sm:$0xff] %v1302_v11 }
 0x252   :  { %1303 = vst [vmem:[#allocation8] sm:$0xff] %v1301_v13 }
 0x253   :  { %2028 = shalt.err (!%p2025_p0)
}
 0x254   :  { %s2029_s12 = scalar_lea.hbm %s2448_s5, 256 }
 0x255   :  { %p2030_p1 = scmp.ne.s32.totalorder %s2448_s5, %s2029_s12  ;;  %p2033_p2 = scmp.lt.u32.totalorder %s2029_s12, %s2448_s5 }
 0x257   :  { %p2035_p3 = pnand %p2033_p2, %p2030_p1 }
 0x259   :  { %2038 = shalt.err (!%p2035_p3)
}
 0x25a   :  { %1316 = dma.vmem_to_hbm [thread:$0]  %s1311_s2, 256, %s2448_s5, [#allocation4], %s2047_s30, %s2047_s30, %s2048_s6  }
 0x25b   :  { %2043 = dma.done.wait [#allocation4], 256  }
 0x25c   :  { %2044 = vsyncadd [#allocation4], 4294967040 }
 0x25d   :  { %1320 = vsyncpa [#allocation3], 1 }
 0x25e   :  { %1321 = vsyncpa [#allocation6], 1 }
 0x25f   :  { %1322 = vsyncpa [#allocation4], 1 }

</bundles_post_ra>
